<compile_context>
chip_gen: v5e
topology: v5e:2x2
jax: 0.10.0
libtpu: 0.0.40
codegen_flags: <defaults>
</compile_context>

<pallas_src>
import math
import functools

import jax
import jax.numpy as jnp
from jax import lax
from jax.experimental import pallas as pl
from jax.experimental.pallas import tpu as pltpu


def _arc_margin_kernel(x_ref, w_ref, label_ref, out_ref, xn_ref, *,
                       scale, cos_m, sin_m, th, mm,
                       easy_margin, with_label, block_c, mxu_dtype):
    eps = 1e-12  # F.normalize default eps
    j = pl.program_id(1)

    # --- Normalize the x tile once per batch tile. The class axis is
    #     "arbitrary" (sequential per core), so j == 0 runs first for every
    #     batch tile on each core and the cached value is always valid. ---
    @pl.when(j == 0)
    def _():
        x = x_ref[...].astype(jnp.float32)                        # (TB, D)
        x_inv = lax.rsqrt(
            jnp.maximum(jnp.sum(x * x, axis=-1, keepdims=True), eps * eps))
        xn_ref[...] = (x * x_inv).astype(xn_ref.dtype)

    # --- Row-normalize the weight tile: rsqrt (EUP) + one multiply (no divide),
    #     broadcast along the lane (D) axis so no relayout is needed. ---
    w = w_ref[...].astype(jnp.float32)                            # (TC, D)
    w_inv = lax.rsqrt(
        jnp.maximum(jnp.sum(w * w, axis=-1, keepdims=True), eps * eps))
    w_n = (w * w_inv).astype(mxu_dtype)

    # cosine = x_n @ w_n^T : contract D directly, no transposed copy of w.
    cosine = lax.dot_general(
        xn_ref[...], w_n,
        dimension_numbers=(((1,), (1,)), ((), ())),
        preferred_element_type=jnp.float32)                       # (TB, TC)

    if not with_label:
        # label is None branch: return cosine * scale
        out_ref[...] = (cosine * scale).astype(out_ref.dtype)
        return

    # Margin math stays in f32. Clamp so rounding (bf16 MXU) can't make
    # 1 - cos^2 negative and poison sqrt with NaN.
    sine = jnp.sqrt(jnp.maximum(1.0 - cosine * cosine, 0.0))
    phi = cosine * cos_m - sine * sin_m
    if easy_margin:
        phi = jnp.where(cosine > 0.0, phi, cosine)
    else:
        phi = jnp.where(cosine > th, phi, cosine - mm)

    # one_hot.scatter_(1, label, 1): compare global column index vs label.
    label = label_ref[...].astype(jnp.int32)                      # (TB, 1)
    col = lax.broadcasted_iota(jnp.int32, cosine.shape, 1) + j * block_c
    is_target = col == label                                      # (TB, TC)

    out = jnp.where(is_target, phi, cosine) * scale
    out_ref[...] = out.astype(out_ref.dtype)                      # single store


def _pick_tile(total, preferred, align):
    """Largest aligned tile <= preferred that divides `total` (or the full dim)."""
    if total <= preferred:
        return total
    t = (preferred // align) * align
    while t >= align:
        if total % t == 0:
            return t
        t -= align
    return total  # fall back: no tiling on this axis


def arc_margin_forward(x, weight, label=None, *, scale=30.0, margin=0.5,
                       easy_margin=False, block_b=None, block_c=None,
                       mxu_dtype=jnp.bfloat16):
    """Pallas implementation of ArcMarginProduct.forward."""
    B, D = x.shape
    C, D2 = weight.shape
    assert D == D2

    tb = block_b if block_b is not None else _pick_tile(B, 128, 8)
    tc = block_c if block_c is not None else _pick_tile(C, 512, 128)
    assert B % tb == 0 and C % tc == 0, "tile sizes must divide array dims"

    cos_m = float(math.cos(margin))
    sin_m = float(math.sin(margin))
    th = float(math.cos(math.pi - margin))
    mm = float(math.sin(math.pi - margin) * margin)

    with_label = label is not None
    if label is None:
        label = jnp.zeros((B,), jnp.int32)  # dummy, unused inside the kernel
    label2d = label.astype(jnp.int32).reshape(B, 1)

    kernel = functools.partial(
        _arc_margin_kernel,
        scale=float(scale), cos_m=cos_m, sin_m=sin_m, th=th, mm=mm,
        easy_margin=easy_margin, with_label=with_label,
        block_c=tc, mxu_dtype=mxu_dtype)

    grid = (B // tb, C // tc)

    return pl.pallas_call(
        kernel,
        out_shape=jax.ShapeDtypeStruct((B, C), jnp.float32),
        grid_spec=pltpu.PrefetchScalarGridSpec(
            num_scalar_prefetch=0,
            grid=grid,
            in_specs=[
                pl.BlockSpec((tb, D), lambda i, j: (i, 0)),   # x tile
                pl.BlockSpec((tc, D), lambda i, j: (j, 0)),   # streamed W tile
                pl.BlockSpec((tb, 1), lambda i, j: (i, 0)),   # labels
            ],
            out_specs=pl.BlockSpec((tb, tc), lambda i, j: (i, j)),
            scratch_shapes=[pltpu.VMEM((tb, D), mxu_dtype)],  # cached x_n
        ),
        compiler_params=pltpu.CompilerParams(
            # Batch tiles shard across TensorCores (v7x megacore); class axis
            # stays sequential so the j == 0 x-normalization cache is valid.
            dimension_semantics=("parallel", "arbitrary"),
        ),
    )(x, weight, label2d)


def _reference_forward(x, weight, label=None, *,
                       scale=30.0, margin=0.5, easy_margin=False):
    """Pure-JAX (f32) reference mirroring the PyTorch module."""
    eps = 1e-12
    x_n = x / jnp.maximum(jnp.linalg.norm(x, axis=-1, keepdims=True), eps)
    w_n = weight / jnp.maximum(
        jnp.linalg.norm(weight, axis=-1, keepdims=True), eps)
    cosine = x_n @ w_n.T
    if label is None:
        return cosine * scale
    cos_m = math.cos(margin)
    sin_m = math.sin(margin)
    th = math.cos(math.pi - margin)
    mm = math.sin(math.pi - margin) * margin
    sine = jnp.sqrt(jnp.maximum(1.0 - cosine ** 2, 0.0))
    phi = cosine * cos_m - sine * sin_m
    if easy_margin:
        phi = jnp.where(cosine > 0, phi, cosine)
    else:
        phi = jnp.where(cosine > th, phi, cosine - mm)
    one_hot = jax.nn.one_hot(label, cosine.shape[1], dtype=cosine.dtype)
    return (one_hot * phi + (1.0 - one_hot) * cosine) * scale


if __name__ == "__main__":
    # Small deterministic problem, sized so the grid is 2x2 (exercises batch
    # tiling, class tiling, the one-hot column offset and the x_n cache).
    B = 16              # batch
    IN_FEATURES = 32    # embedding dim
    OUT_FEATURES = 256  # number of classes

    key = jax.random.PRNGKey(0)
    k_x, k_w, k_l = jax.random.split(key, 3)

    # Xavier-uniform init for weight (out_features, in_features)
    bound = math.sqrt(6.0 / (IN_FEATURES + OUT_FEATURES))
    weight = jax.random.uniform(
        k_w, (OUT_FEATURES, IN_FEATURES), jnp.float32,
        minval=-bound, maxval=bound)

    x = jax.random.normal(k_x, (B, IN_FEATURES), jnp.float32)
    label = jax.random.randint(k_l, (B,), 0, OUT_FEATURES, jnp.int32)

    # bf16 MXU operands -> relaxed tolerance vs the f32 reference.
    ATOL, RTOL = 8e-2, 2e-2

    # Training path (with labels), forced 2x2 grid.
    out = arc_margin_forward(x, weight, label, block_b=8, block_c=128)
    out = jax.block_until_ready(out)
    ref = _reference_forward(x, weight, label)
    assert out.shape == (B, OUT_FEATURES)
    assert jnp.allclose(out, ref, atol=ATOL, rtol=RTOL), (
        "label path mismatch, max abs err = "
        f"{float(jnp.max(jnp.abs(out - ref)))}")

    # Inference path (label=None): cosine * scale
    out_nl = arc_margin_forward(x, weight, None, block_b=8, block_c=128)
    out_nl = jax.block_until_ready(out_nl)
    ref_nl = _reference_forward(x, weight, None)
    assert jnp.allclose(out_nl, ref_nl, atol=ATOL, rtol=RTOL), (
        "no-label path mismatch")

    # Auto tile selection (single-tile grid) path.
    out_auto = arc_margin_forward(x, weight, label)
    out_auto = jax.block_until_ready(out_auto)
    assert jnp.allclose(out_auto, ref, atol=ATOL, rtol=RTOL), (
        "auto-tile path mismatch")

    print("KERNEL_OK")
</pallas_src>

<mosaic_0001>
module attributes {stable_mosaic.version = 11 : i64} {
  func.func @_arc_margin_kernel(%arg0: i32, %arg1: i32, %arg2: memref<8x32xf32, #tpu.memory_space<vmem>>, %arg3: memref<128x32xf32, #tpu.memory_space<vmem>>, %arg4: memref<8x1xi32, #tpu.memory_space<vmem>>, %arg5: memref<8x128xf32, #tpu.memory_space<vmem>>, %arg6: memref<8x32xbf16, #tpu.memory_space<vmem>>) attributes {dimension_semantics = [#tpu.dimension_semantics<parallel>, #tpu.dimension_semantics<arbitrary>], iteration_bounds = array<i64: 2, 2>, scalar_prefetch = 0 : i64, scratch_operands = 1 : i64, tpu.core_type = #tpu.core_type<tc>, window_params = [{transform_indices = @transform_0, window_bounds = array<i64: 8, 32>}, {transform_indices = @transform_1, window_bounds = array<i64: 128, 32>}, {transform_indices = @transform_2, window_bounds = array<i64: 8, 1>}, {transform_indices = @transform_3, window_bounds = array<i64: 8, 128>}]} {
    %c0_i32 = arith.constant 0 : i32
    %0 = arith.cmpi eq, %arg1, %c0_i32 : i32
    %1 = arith.extui %0 : i1 to i32
    %c0_i32_0 = arith.constant 0 : i32
    %2 = arith.cmpi ne, %1, %c0_i32_0 : i32
    scf.if %2 {
      %c0_17 = arith.constant 0 : index
      %c0_18 = arith.constant 0 : index
      %42 = vector.load %arg2[%c0_17, %c0_18] : memref<8x32xf32, #tpu.memory_space<vmem>>, vector<8x32xf32>
      %43 = arith.mulf %42, %42 : vector<8x32xf32>
      %cst_19 = arith.constant dense<0.000000e+00> : vector<8xf32>
      %44 = vector.multi_reduction <add>, %43, %cst_19 [1] : vector<8x32xf32> to vector<8xf32>
      %45 = vector.shape_cast %44 : vector<8xf32> to vector<8x1xf32>
      %cst_20 = arith.constant 1.000000e-24 : f32
      %46 = vector.broadcast %cst_20 : f32 to vector<8x1xf32>
      %47 = arith.maximumf %45, %46 : vector<8x1xf32>
      %48 = math.rsqrt %47 : vector<8x1xf32>
      %49 = vector.broadcast %48 : vector<8x1xf32> to vector<8x32xf32>
      %50 = arith.mulf %42, %49 : vector<8x32xf32>
      %51 = arith.truncf %50 : vector<8x32xf32> to vector<8x32xbf16>
      %c0_21 = arith.constant 0 : index
      %c0_22 = arith.constant 0 : index
      %52 = vector.load %arg6[%c0_21, %c0_22] : memref<8x32xbf16, #tpu.memory_space<vmem>>, vector<8x32xbf16>
      tpu.vector_store %arg6[%c0_21, %c0_22], %51 {strides = array<i32>} : memref<8x32xbf16, #tpu.memory_space<vmem>>, vector<8x32xbf16>,
    } else {
    }
    %c0 = arith.constant 0 : index
    %c0_1 = arith.constant 0 : index
    %3 = vector.load %arg3[%c0, %c0_1] : memref<128x32xf32, #tpu.memory_space<vmem>>, vector<128x32xf32>
    %4 = arith.mulf %3, %3 : vector<128x32xf32>
    %cst = arith.constant dense<0.000000e+00> : vector<128xf32>
    %5 = vector.multi_reduction <add>, %4, %cst [1] : vector<128x32xf32> to vector<128xf32>
    %6 = vector.shape_cast %5 : vector<128xf32> to vector<128x1xf32>
    %cst_2 = arith.constant 1.000000e-24 : f32
    %7 = vector.broadcast %cst_2 : f32 to vector<128x1xf32>
    %8 = arith.maximumf %6, %7 : vector<128x1xf32>
    %9 = math.rsqrt %8 : vector<128x1xf32>
    %10 = vector.broadcast %9 : vector<128x1xf32> to vector<128x32xf32>
    %11 = arith.mulf %3, %10 : vector<128x32xf32>
    %12 = arith.truncf %11 : vector<128x32xf32> to vector<128x32xbf16>
    %c0_3 = arith.constant 0 : index
    %c0_4 = arith.constant 0 : index
    %13 = vector.load %arg6[%c0_3, %c0_4] : memref<8x32xbf16, #tpu.memory_space<vmem>>, vector<8x32xbf16>
    %cst_5 = arith.constant dense<0.000000e+00> : vector<8x128xf32>
    %14 = tpu.matmul %13, %12, %cst_5 {dimension_numbers = #tpu.dot_dimension_numbers<[1], [1], [0], [0], [0, 0, 1, 0], [], []>} : vector<8x32xbf16>, vector<128x32xbf16>, vector<8x128xf32> -> vector<8x128xf32>
    %15 = arith.mulf %14, %14 : vector<8x128xf32>
    %cst_6 = arith.constant 1.000000e+00 : f32
    %16 = vector.broadcast %cst_6 : f32 to vector<8x128xf32>
    %17 = arith.subf %16, %15 : vector<8x128xf32>
    %cst_7 = arith.constant 0.000000e+00 : f32
    %18 = vector.broadcast %cst_7 : f32 to vector<8x128xf32>
    %19 = arith.maximumf %17, %18 : vector<8x128xf32>
    %20 = math.sqrt %19 : vector<8x128xf32>
    %cst_8 = arith.constant 0.87758255 : f32
    %21 = vector.broadcast %cst_8 : f32 to vector<8x128xf32>
    %22 = arith.mulf %14, %21 : vector<8x128xf32>
    %cst_9 = arith.constant 0.47942555 : f32
    %23 = vector.broadcast %cst_9 : f32 to vector<8x128xf32>
    %24 = arith.mulf %20, %23 : vector<8x128xf32>
    %25 = arith.subf %22, %24 : vector<8x128xf32>
    %cst_10 = arith.constant -0.87758255 : f32
    %26 = vector.broadcast %cst_10 : f32 to vector<8x128xf32>
    %27 = arith.cmpf ogt, %14, %26 : vector<8x128xf32>
    %cst_11 = arith.constant 0.239712775 : f32
    %28 = vector.broadcast %cst_11 : f32 to vector<8x128xf32>
    %29 = arith.subf %14, %28 : vector<8x128xf32>
    %30 = arith.select %27, %25, %29 : vector<8x128xi1>, vector<8x128xf32>
    %c0_12 = arith.constant 0 : index
    %c0_13 = arith.constant 0 : index
    %31 = vector.load %arg4[%c0_12, %c0_13] : memref<8x1xi32, #tpu.memory_space<vmem>>, vector<8x1xi32>
    %32 = tpu.iota {dimensions = array<i32: 1>} : vector<8x128xi32>
    %c128_i32 = arith.constant 128 : i32
    %33 = arith.muli %arg1, %c128_i32 : i32
    %34 = vector.broadcast %33 : i32 to vector<8x128xi32>
    %35 = arith.addi %32, %34 : vector<8x128xi32>
    %36 = vector.broadcast %31 : vector<8x1xi32> to vector<8x128xi32>
    %37 = arith.cmpi eq, %35, %36 : vector<8x128xi32>
    %38 = arith.select %37, %30, %14 : vector<8x128xi1>, vector<8x128xf32>
    %cst_14 = arith.constant 3.000000e+01 : f32
    %39 = vector.broadcast %cst_14 : f32 to vector<8x128xf32>
    %40 = arith.mulf %38, %39 : vector<8x128xf32>
    %c0_15 = arith.constant 0 : index
    %c0_16 = arith.constant 0 : index
    %41 = vector.load %arg5[%c0_15, %c0_16] : memref<8x128xf32, #tpu.memory_space<vmem>>, vector<8x128xf32>
    tpu.vector_store %arg5[%c0_15, %c0_16], %40 {strides = array<i32>} : memref<8x128xf32, #tpu.memory_space<vmem>>, vector<8x128xf32>,
    return
  }
  func.func @transform_0(%arg0: i32, %arg1: i32) -> (i32, i32) {
    %c0_i32 = arith.constant 0 : i32
    %c0_i32_0 = arith.constant 0 : i32
    return %arg0, %c0_i32 : i32, i32
  }
  func.func @transform_1(%arg0: i32, %arg1: i32) -> (i32, i32) {
    %c0_i32 = arith.constant 0 : i32
    %c0_i32_0 = arith.constant 0 : i32
    return %arg1, %c0_i32 : i32, i32
  }
  func.func @transform_2(%arg0: i32, %arg1: i32) -> (i32, i32) {
    %c0_i32 = arith.constant 0 : i32
    %c0_i32_0 = arith.constant 0 : i32
    return %arg0, %c0_i32 : i32, i32
  }
  func.func @transform_3(%arg0: i32, %arg1: i32) -> (i32, i32) {
    %c0_i32 = arith.constant 0 : i32
    return %arg0, %arg1 : i32, i32
  }
}

</mosaic_0001>

<bundles_post_ra>
// kernel: tpu_custom_call.1
= control target key start
LH: loop header
LB: loop body
LE: loop exit
PB: predicated region body
PF: predicated region fallthrough
CT: control target
= control target key end

     0   :  { %8 = vsyncpa [#allocation4], 0  ;;  %s1490_s0 = inlined_call_operand.vmem [shape: f32[16,32], index: 0, kind: input, shape index: {}]   ;;  %s1491_s1 = inlined_call_operand.vmem [shape: f32[256,32], index: 1, kind: input, shape index: {}]   ;;  %s1492_s2 = inlined_call_operand.vmem [shape: s32[16,1], index: 2, kind: input, shape index: {}]   ;;  %s1493_s3 = inlined_call_operand.hbm [shape: f32[16,256], index: 3, kind: output, shape index: {}]  }
   0x1   :  { %10 = vsyncpa [#allocation4 + $0x1], 0  ;;  %s960_s12 = smov 0   ;;  %s962_s13 = smov 0  }
   0x2   :  { %s964_s14 = smov 0   ;;  %s966_s15 = smov 0  }
   0x3   :  { %s968_s16 = smov 0   ;;  %s970_s17 = smov 0  }
   0x4   :  { %s972_s18 = smov 0   ;;  %s974_s19 = smov 0  }
   0x5 LB: > { %s714_s20 = sadd.s32 4294967295, %s937_s19   ;;  %s715_s21 = sadd.s32 4294967294, %s937_s19   ;;  %s937_s19 = sphi %s974_s19, %s16_s19   ;;  %s933_s18 = sphi %s972_s18, %s1529_s18   ;;  %s929_s17 = sphi %s970_s17, %s1528_s17   ;;  %s925_s16 = sphi %s968_s16, %s1527_s16   ;;  %s921_s15 = sphi %s966_s15, %s1526_s15   ;;  %s917_s14 = sphi %s964_s14, %s1525_s14   ;;  %s913_s13 = sphi %s962_s13, %s1524_s13   ;;  %s909_s12 = sphi %s960_s12, %s1523_s12  }
   0x6   : > { %s25_s22 = sadd.s32 1, %s929_s17  ;;  %s28_s23 = sadd.s32 1, %s933_s18 }
   0x7   : > { %p26_p0 = scmp.ge.s32.totalorder %s25_s22, 2  ;;  %p125_p1 = scmp.ne.s32.totalorder %s917_s14, %s913_s13 }
   0x8   : > { %p126_p2 = scmp.eq.s32.totalorder %s714_s20, 3  ;;  %p131_p5 = scmp.ne.s32.totalorder %s913_s13, %s909_s12 }
   0x9   : > { %s1531_s22 = smov (%p26_p0, %s25_s22), 0  ;;  %s1533_s23 = smov (!%p26_p0, %s28_s23), %s933_s18 }
   0xa   : > { %s111_s24 = ssub.s32 %s929_s17, %s1531_s22  ;;  %p1011_p3 = por %p126_p2, %p125_p1 }
   0xb   : > { %p30_p4 = scmp.ge.s32.totalorder %s1533_s23, 2  ;;  %p132_p6 = scmp.eq.s32.totalorder %s715_s21, 3 }
   0xc   : > { %p718_p7 = scmp.ge.s32.totalorder %s937_s19, 1  ;;  %p173_p9 = scmp.lt.s32.totalorder %s937_s19, 5 }
   0xd   : > { %s1535_s23 = smov (%p30_p4, %s1533_s23), 0  ;;  %p1020_p8 = por %p132_p6, %p131_p5 }
   0xe   : > { %1497 = sst [smem:[#allocation6_spill]] %s1535_s23  ;;  %s110_s27 = ssub.s32 %s933_s18, %s1535_s23 }
   0xf   : > { %s115_s28 = sadd.s32 1, %s917_s14  ;;  %s112_s29 = sor.u32 %s111_s24, %s110_s27 }
  0x10   : > { %p174_p10 = pnand %p718_p7, %p173_p9  ;;  %p113_p11 = scmp.eq.s32.totalorder %s112_s29, 0 }
  0x11   : > { %s1494_s4 = sand.u32 (!%p174_p10), 1, %s913_s13   ;;  %p205_p12 = scmp.lt.s32.totalorder (!%p174_p10), %s925_s16, 1 }
  0x12   : > { %s1029_s30 = scalar_select %p113_p11, %s917_s14, %s115_s28  }
  0x13   : > { %177 = sbr.rel (%p174_p10) target bundleno = 555 (0x22b), region = 32  ;;  %s1035_s5 = sshll.u32 (!%p174_p10), %s1494_s4, 3 }
  0x14   : > { %s721_s6 = sshll.u32 (!%p174_p10), %s921_s15, 4  ;;  %s204_s23 = scalar_lea.vmem (!%p174_p10), [#allocation3], %s1035_s5 }
  0x15   : > { %p210_p13 = scmp.lt.s32.totalorder (!%p174_p10), %s721_s6, 31  ;;  %p724_p0 = scmp.ne.s32.totalorder (!%p174_p10), %s921_s15, 0 }
  0x18   : > { %s206_s7 = scalar_select %p205_p12, %s925_s16, 1 }
  0x19   : > { %s1537_s6 = smov (!%p210_p13, %s721_s6), 31  ;;  %222 = sbr.rel (%p724_p0) target bundleno = 175 (0xaf), region = 36 }
  0x1a   : > { %s720_s8 = sshll.u32 %s206_s7, 3  ;;  %s722_s20 = sshll.u32 %s1537_s6, 3 }
  0x1b   : > { %s208_s11 = scalar_lea.vmem %s1490_s0, %s720_s8  ;;  %s1045_s27 = scalar_lea.vmem %s1491_s1, %s722_s20 }
  0x1c   : > { %s1050_s4 = scalar_lea.vmem %s1492_s2, %s720_s8 }
  0x1e   : > { %v223_v0 = vld [vmem:[%s208_s11] sm:$0xff]  ;;  %vm225_vm0 = vcmask 261120   ;;  %vm242_vm4 = vcmask 257024  }
  0x1f   : > { %v224_v1 = vmul.f32 %v223_v0, %v223_v0 }
  0x21   : > { %v226_v2 = vsel %vm225_vm0, %v224_v1, 0.0 }
  0x22   : > { %227 = vadd.xlane.f32.xlu0 %v226_v2 }
  0x95   : > { %v228_v3 = vpop.xlane.xlu0 %227 }
  0x96   : > { %v229_v4 = vmax.f32 %v228_v3, 1e-24 }
  0x98   : > { %805 = vrsqrt.f32 %v229_v4  ;;  %vm236_vm2 = vweird.f32 %v229_v4 }
  0x9e   : > { %v806_v5 = vpop.eup %805 }
  0x9f   : > { %v231_v6 = vmul.f32 %v806_v5, %v229_v4  ;;  %vm237_vm1 = vweird.f32 %v806_v5 }
  0xa0   : > { %vm238_vm3 = vmor %vm236_vm2, %vm237_vm1 }
  0xa1   : > { %v232_v7 = vmul.f32 %v806_v5, %v231_v6 }
  0xa3   : > { %v233_v8 = vmul.f32 0.5, %v232_v7 }
  0xa5   : > { %v234_v9 = vsub.f32 1.5, %v233_v8 }
  0xa7   : > { %v235_v10 = vmul.f32 %v806_v5, %v234_v9 }
  0xa9   : > { %v239_v11 = vsel %vm238_vm3, %v806_v5, %v235_v10 }
  0xaa   : > { %v240_v12 = vmul.f32 %v239_v11, %v223_v0 }
  0xac   : > { %v241_v13 = vpack.c.bf16 %v240_v12, %v240_v12 }
  0xae   : > { %243 = vst.msk [vmem:[#allocation2] sm:$0xf] %vm242_vm4, %v241_v13 }
  0xaf PF: > { %v1055_v14 = vld [vmem:[%s1045_s27 + $0x70] sm:$0xff]  ;;  %vm276_vm5 = vcmask 261120   ;;  %v1058_v15 = vld [vmem:[%s1045_s27 + $0x60] sm:$0xff]  ;;  %v1070_v20 = vld [vmem:[%s1045_s27 + $0x78] sm:$0xff]  ;;  %s727_s6 = sshll.u32 %s921_s15, 7  ;;  %s1521_s20 = sand.u32 1, %s913_s13  }
  0xb0   : > { %v1061_v16 = vld [vmem:[%s1045_s27 + $0x50] sm:$0xff]  ;;  %v274_v17 = vmul.f32 %v1055_v14, %v1055_v14  ;;  %v272_v18 = vmul.f32 %v1058_v15, %v1058_v15  ;;  %v1073_v21 = vld [vmem:[%s1045_s27 + $0x68] sm:$0xff]  ;;  %v1079_v25 = vld [vmem:[%s1045_s27 + $0x58] sm:$0xff]  ;;  %v275_v26 = vmul.f32 %v1070_v20, %v1070_v20  ;;  %s601_s21 = scalar_lea.sflag [#allocation4], %s1521_s20 }
  0xb1   : > { %v270_v19 = vmul.f32 %v1061_v16, %v1061_v16  ;;  %v273_v27 = vmul.f32 %v1073_v21, %v1073_v21  ;;  %v271_v28 = vmul.f32 %v1079_v25, %v1079_v25  ;;  %v1091_v32 = vld [vmem:[%s1045_s27 + $0x48] sm:$0xff]  ;;  %v1094_v33 = vld [vmem:[%s1045_s27 + $0x40] sm:$0xff]  ;;  %v1097_v34 = vld [vmem:[%s1045_s27 + $0x30] sm:$0xff] }
  0xb2   : > { %v319_v22 = vsel %vm276_vm5, %v274_v17, 0.0  ;;  %v313_v23 = vsel %vm276_vm5, %v272_v18, 0.0  ;;  %v322_v29 = vsel %vm276_vm5, %v275_v26, 0.0  ;;  %v269_v35 = vmul.f32 %v1091_v32, %v1091_v32  ;;  %v1108_v40 = vld [vmem:[%s1045_s27 + $0x38] sm:$0xff]  ;;  %v1112_v42 = vld [vmem:[%s1045_s27 + $0x20] sm:$0xff]  ;;  %v1115_v43 = vld [vmem:[%s1045_s27 + $0x28] sm:$0xff] }
  0xb3   : > { %v307_v24 = vsel %vm276_vm5, %v270_v19, 0.0  ;;  %320 = vadd.xlane.f32.xlu0 %v319_v22  ;;  %314 = vadd.xlane.f32.xlu1 %v313_v23  ;;  %v316_v30 = vsel %vm276_vm5, %v273_v27, 0.0  ;;  %v310_v31 = vsel %vm276_vm5, %v271_v28, 0.0  ;;  %v268_v36 = vmul.f32 %v1094_v33, %v1094_v33  ;;  %v1127_v50 = vld [vmem:[%s1045_s27 + $0x18] sm:$0xff]  ;;  %v1130_v51 = vld [vmem:[%s1045_s27 + $0x10] sm:$0xff]  ;;  %v1133_v52 = vld [vmem:[%s1045_s27] sm:$0xff] }
  0xb4   : > { %308 = vadd.xlane.f32.xlu2 %v307_v24  ;;  %v266_v37 = vmul.f32 %v1097_v34, %v1097_v34  ;;  %v304_v38 = vsel %vm276_vm5, %v269_v35, 0.0  ;;  %v267_v44 = vmul.f32 %v1108_v40, %v1108_v40  ;;  %v264_v45 = vmul.f32 %v1112_v42, %v1112_v42  ;;  %v1144_v58 = vld [vmem:[%s1045_s27 + $0x8] sm:$0xff] }
  0xb5   : > { %v301_v39 = vsel %vm276_vm5, %v268_v36, 0.0  ;;  %v265_v46 = vmul.f32 %v1115_v43, %v1115_v43  ;;  %v263_v53 = vmul.f32 %v1127_v50, %v1127_v50  ;;  %v262_v54 = vmul.f32 %v1130_v51, %v1130_v51 }
  0xb6   : > { %v295_v41 = vsel %vm276_vm5, %v266_v37, 0.0  ;;  %v298_v47 = vsel %vm276_vm5, %v267_v44, 0.0  ;;  %v289_v48 = vsel %vm276_vm5, %v264_v45, 0.0  ;;  %v260_v55 = vmul.f32 %v1133_v52, %v1133_v52 }
  0xb7   : > { %v292_v49 = vsel %vm276_vm5, %v265_v46, 0.0  ;;  %v286_v56 = vsel %vm276_vm5, %v263_v53, 0.0  ;;  %v283_v57 = vsel %vm276_vm5, %v262_v54, 0.0  ;;  %v261_v60 = vmul.f32 %v1144_v58, %v1144_v58 }
  0xb8   : > { %v277_v59 = vsel %vm276_vm5, %v260_v55, 0.0 }
  0xb9   : > { %v280_v61 = vsel %vm276_vm5, %v261_v60, 0.0 }
  0xbb   : > { %323 = vadd.xlane.f32.xlu0 %v322_v29  ;;  %317 = vadd.xlane.f32.xlu1 %v316_v30 }
  0xbc   : > { %311 = vadd.xlane.f32.xlu2 %v310_v31 }
  0xc3   : > { %305 = vadd.xlane.f32.xlu1 %v304_v38  ;;  %302 = vadd.xlane.f32.xlu0 %v301_v39 }
  0xc4   : > { %296 = vadd.xlane.f32.xlu2 %v295_v41 }
  0xcb   : > { %299 = vadd.xlane.f32.xlu0 %v298_v47  ;;  %290 = vadd.xlane.f32.xlu1 %v289_v48 }
  0xcc   : > { %293 = vadd.xlane.f32.xlu2 %v292_v49 }
  0xd3   : > { %287 = vadd.xlane.f32.xlu1 %v286_v56  ;;  %284 = vadd.xlane.f32.xlu0 %v283_v57 }
  0xd4   : > { %278 = vadd.xlane.f32.xlu2 %v277_v59 }
  0xdb   : > { %281 = vadd.xlane.f32.xlu0 %v280_v61 }
 0x126   : > { %v321_v62 = vpop.xlane.xlu0 %320  ;;  %v315_v63 = vpop.xlane.xlu1 %314 }
 0x127   : > { %v339_v0 = vmax.f32 %v321_v62, 1e-24  ;;  %v309_v1 = vpop.xlane.xlu2 %308  ;;  %v1150_v2 = vmax.f32 %v315_v63, 1e-24 }
 0x128   : > { %v1162_v11 = vmax.f32 %v309_v1, 1e-24 }
 0x129   : > { %809 = vrsqrt.f32 %v339_v0  ;;  %vm487_vm7 = vweird.f32 %v339_v0  ;;  %vm467_vm13 = vweird.f32 %v1150_v2 }
 0x12a   : > { %811 = vrsqrt.f32 %v1150_v2  ;;  %vm447_vm2 = vweird.f32 %v1162_v11 }
 0x12e   : > { %v324_v3 = vpop.xlane.xlu0 %323  ;;  %v318_v4 = vpop.xlane.xlu1 %317 }
 0x12f   : > { %v1153_v5 = vpop.eup %809  ;;  %v1155_v6 = vmax.f32 %v324_v3, 1e-24  ;;  %v1157_v7 = vmax.f32 %v318_v4, 1e-24  ;;  %v312_v8 = vpop.xlane.xlu2 %311 }
 0x130   : > { %v482_v9 = vmul.f32 %v1153_v5, %v339_v0  ;;  %v1160_v10 = vmax.f32 %v312_v8, 1e-24  ;;  %v1166_v12 = vpop.eup %811  ;;  %vm488_vm6 = vweird.f32 %v1153_v5 }
 0x131   : > { %813 = vrsqrt.f32 %v1155_v6  ;;  %v462_v17 = vmul.f32 %v1166_v12, %v1150_v2  ;;  %vm497_vm8 = vweird.f32 %v1155_v6  ;;  %vm477_vm9 = vweird.f32 %v1157_v7  ;;  %vm1207_vm10 = vmor %vm487_vm7, %vm488_vm6 }
 0x132   : > { %815 = vrsqrt.f32 %v1157_v7  ;;  %v483_v13 = vmul.f32 %v1153_v5, %v482_v9  ;;  %vm468_vm15 = vweird.f32 %v1166_v12  ;;  %vm457_vm4 = vweird.f32 %v1160_v10 }
 0x133   : > { %817 = vrsqrt.f32 %v1160_v10  ;;  %v463_v35 = vmul.f32 %v1166_v12, %v462_v17  ;;  %vm1253_vm1 = vmor %vm467_vm13, %vm468_vm15 }
 0x134   : > { %819 = vrsqrt.f32 %v1162_v11  ;;  %v484_v23 = vmul.f32 0.5, %v483_v13 }
 0x135   : > { %v464_v46 = vmul.f32 0.5, %v463_v35 }
 0x136   : > { %v306_v18 = vpop.xlane.xlu1 %305  ;;  %v303_v19 = vpop.xlane.xlu0 %302  ;;  %v485_v38 = vsub.f32 1.5, %v484_v23 }
 0x137   : > { %v814_v22 = vpop.eup %813  ;;  %v1173_v24 = vmax.f32 %v306_v18, 1e-24  ;;  %v1175_v26 = vmax.f32 %v303_v19, 1e-24  ;;  %v297_v29 = vpop.xlane.xlu2 %296  ;;  %v465_v63 = vsub.f32 1.5, %v464_v46 }
 0x138   : > { %v1177_v27 = vpop.eup %815  ;;  %v492_v28 = vmul.f32 %v814_v22, %v1155_v6  ;;  %v1194_v49 = vmax.f32 %v297_v29, 1e-24  ;;  %v486_v55 = vmul.f32 %v1153_v5, %v485_v38  ;;  %vm498_vm11 = vweird.f32 %v814_v22 }
 0x139   : > { %v1180_v30 = vpop.eup %817  ;;  %v472_v31 = vmul.f32 %v1177_v27, %v1157_v7  ;;  %821 = vrsqrt.f32 %v1173_v24  ;;  %vm478_vm12 = vweird.f32 %v1177_v27  ;;  %vm499_vm14 = vmor %vm497_vm8, %vm498_vm11  ;;  %v466_v23 = vmul.f32 %v1166_v12, %v465_v63 }
 0x13a   : > { %v493_v36 = vmul.f32 %v814_v22, %v492_v28  ;;  %v1186_v37 = vpop.eup %819  ;;  %v452_v41 = vmul.f32 %v1180_v30, %v1160_v10  ;;  %823 = vrsqrt.f32 %v1175_v26  ;;  %v490_v0 = vsel %vm1207_vm10, %v1153_v5, %v486_v55  ;;  %vm1234_vm0 = vmor %vm477_vm9, %vm478_vm12 }
 0x13b   : > { %v473_v39 = vmul.f32 %v1177_v27, %v472_v31  ;;  %v442_v47 = vmul.f32 %v1186_v37, %v1162_v11  ;;  %825 = vrsqrt.f32 %v1194_v49  ;;  %v515_v6 = vmul.f32 %v490_v0, %v1055_v14 }
 0x13c   : > { %v494_v44 = vmul.f32 0.5, %v493_v36  ;;  %v453_v53 = vmul.f32 %v1180_v30, %v452_v41  ;;  %vm448_vm3 = vweird.f32 %v1186_v37  ;;  %vm458_vm6 = vweird.f32 %v1180_v30 }
 0x13d   : > { %v474_v45 = vmul.f32 0.5, %v473_v39  ;;  %v443_v1 = vmul.f32 %v1186_v37, %v442_v47  ;;  %v470_v2 = vsel %vm1253_vm1, %v1166_v12, %v466_v23  ;;  %vm1273_vm7 = vmor %vm457_vm4, %vm458_vm6  ;;  %vm437_vm9 = vweird.f32 %v1173_v24 }
 0x13e   : > { %v300_v48 = vpop.xlane.xlu0 %299  ;;  %v495_v57 = vsub.f32 1.5, %v494_v44  ;;  %v291_v60 = vpop.xlane.xlu1 %290  ;;  %v454_v4 = vmul.f32 0.5, %v453_v53  ;;  %vm1287_vm8 = vmor %vm447_vm2, %vm448_vm3  ;;  %vm427_vm11 = vweird.f32 %v1175_v26 }
 0x13f   : > { %v1198_v54 = vmax.f32 %v300_v48, 1e-24  ;;  %v1201_v56 = vpop.eup %821  ;;  %v475_v59 = vsub.f32 1.5, %v474_v45  ;;  %v294_v3 = vpop.xlane.xlu2 %293  ;;  %v444_v19 = vmul.f32 0.5, %v443_v1  ;;  %v1238_v29 = vmax.f32 %v291_v60, 1e-24 }
 0x140   : > { %v1203_v61 = vpop.eup %823  ;;  %v432_v8 = vmul.f32 %v1201_v56, %v1173_v24  ;;  %v496_v13 = vmul.f32 %v814_v22, %v495_v57  ;;  %v1226_v18 = vmax.f32 %v294_v3, 1e-24  ;;  %v455_v36 = vsub.f32 1.5, %v454_v4 }
 0x141   : > { %827 = vrsqrt.f32 %v1198_v54  ;;  %v422_v9 = vmul.f32 %v1203_v61, %v1175_v26  ;;  %v476_v17 = vmul.f32 %v1177_v27, %v475_v59  ;;  %v1242_v35 = vpop.eup %825  ;;  %v513_v59 = vmul.f32 %v470_v2, %v1058_v15 }
 0x142   : > { %v500_v5 = vsel %vm499_vm14, %v814_v22, %v496_v13  ;;  %v433_v22 = vmul.f32 %v1201_v56, %v432_v8  ;;  %829 = vrsqrt.f32 %v1226_v18  ;;  %v402_v45 = vmul.f32 %v1242_v35, %v1194_v49 }
 0x143   : > { %v516_v31 = vmul.f32 %v500_v5, %v1070_v20  ;;  %v423_v38 = vmul.f32 %v1203_v61, %v422_v9  ;;  %v480_v7 = vsel %vm1234_vm0, %v1177_v27, %v476_v17  ;;  %v445_v20 = vsub.f32 1.5, %v444_v19 }
 0x144   : > { %831 = vrsqrt.f32 %v1238_v29  ;;  %v514_v47 = vmul.f32 %v480_v7, %v1073_v21  ;;  %v434_v48 = vmul.f32 0.5, %v433_v22  ;;  %v456_v55 = vmul.f32 %v1180_v30, %v455_v36 }
 0x145   : > { %v524_v14 = vpack.c.bf16 %v516_v31, %v515_v6  ;;  %v424_v53 = vmul.f32 0.5, %v423_v38  ;;  %v446_v60 = vmul.f32 %v1186_v37, %v445_v20  ;;  %v403_v63 = vmul.f32 %v1242_v35, %v402_v45 }
 0x146   : > { %v288_v27 = vpop.xlane.xlu1 %287  ;;  %v285_v44 = vpop.xlane.xlu0 %284  ;;  %v523_v3 = vpack.c.bf16 %v514_v47, %v513_v59  ;;  %v435_v4 = vsub.f32 1.5, %v434_v48  ;;  %v460_v8 = vsel %vm1273_vm7, %v1180_v30, %v456_v55  ;;  %vm438_vm10 = vweird.f32 %v1201_v56 }
 0x147   : > { %v1249_v39 = vpop.eup %827  ;;  %v551_v46 = vsel %vm276_vm5, %v524_v14, 0  ;;  %v1277_v12 = vmax.f32 %v288_v27, 1e-24  ;;  %v1292_v1 = vmax.f32 %v285_v44, 1e-24  ;;  %v425_v0 = vsub.f32 1.5, %v424_v53  ;;  %v279_v17 = vpop.xlane.xlu2 %278  ;;  %vm1313_vm13 = vmor %vm437_vm9, %vm438_vm10 }
 0x148   : > { %v412_v10 = vmul.f32 %v1249_v39, %v1198_v54  ;;  %553 = vmatpush.bf16.xpose.msra.mxu0 %v551_v46  ;;  %v1281_v62 = vpop.eup %829  ;;  %vm428_vm12 = vweird.f32 %v1203_v61  ;;  %v450_v13 = vsel %vm1287_vm8, %v1186_v37, %v446_v60  ;;  %v404_v30 = vmul.f32 0.5, %v403_v63 }
 0x149   : > { %833 = vrsqrt.f32 %v1277_v12  ;;  %v392_v11 = vmul.f32 %v1281_v62, %v1226_v18  ;;  %v548_v24 = vsel %vm276_vm5, %v523_v3, 0  ;;  %v512_v19 = vmul.f32 %v460_v8, %v1079_v25  ;;  %vm1325_vm14 = vmor %vm427_vm11, %vm428_vm12 }
 0x14a   : > { %v413_v15 = vmul.f32 %v1249_v39, %v412_v10  ;;  %v1298_v9 = vpop.eup %831  ;;  %835 = vrsqrt.f32 %v1292_v1  ;;  %v426_v37 = vmul.f32 %v1203_v61, %v425_v0  ;;  %v436_v31 = vmul.f32 %v1201_v56, %v435_v4 }
 0x14b   : > { %v382_v28 = vmul.f32 %v1298_v9, %v1238_v29  ;;  %v511_v36 = vmul.f32 %v450_v13, %v1061_v16  ;;  %v393_v22 = vmul.f32 %v1281_v62, %v392_v11  ;;  %v1331_v38 = vmax.f32 %v279_v17, 1e-24 }
 0x14c   : > { %v414_v23 = vmul.f32 0.5, %v413_v15  ;;  %v405_v41 = vsub.f32 1.5, %v404_v30  ;;  %v430_v26 = vsel %vm1325_vm14, %v1203_v61, %v426_v37  ;;  %v440_v16 = vsel %vm1313_vm13, %v1201_v56, %v436_v31  ;;  %v587_v31 = vld [vmem:[%s1050_s4] sm:$0xff]  ;;  %s729_s4 = sshll.u32 %s925_s16, 1 }
 0x14d   : > { %v522_v20 = vpack.c.bf16 %v512_v19, %v511_v36  ;;  %v383_v44 = vmul.f32 %v1298_v9, %v382_v28  ;;  %vm417_vm15 = vweird.f32 %v1198_v54  ;;  %vm407_vm0 = vweird.f32 %v1194_v49  ;;  %s611_s7 = sadd.s32 %s921_s15, %s729_s4  ;;  %s615_s15 = sshll.u32 %s204_s23, 4  ;;  %s616_s15 = int_to_ptr.vmem [resolvable:$true] %s615_s15 }
 0x14e   : > { %v282_v6 = vpop.xlane.xlu0 %281  ;;  %v415_v27 = vsub.f32 1.5, %v414_v23  ;;  %vm408_vm1 = vweird.f32 %v1242_v35  ;;  %vm418_vm2 = vweird.f32 %v1249_v39  ;;  %v394_v45 = vmul.f32 0.5, %v393_v22  ;;  %s730_s8 = sshll.u32 %s611_s7, 3  ;;  %s863_s4 = scalar_lea.hbm %s1493_s3, 32 }
 0x14f   : > { %v1333_v7 = vpop.eup %833  ;;  %v1335_v14 = vmax.f32 %v282_v6, 1e-24  ;;  %837 = vrsqrt.f32 %v1331_v38  ;;  %v545_v56 = vsel %vm276_vm5, %v522_v20, 0  ;;  %v509_v61 = vmul.f32 %v430_v26, %v1094_v33  ;;  %vm1357_vm3 = vmor %vm407_vm0, %vm408_vm1  ;;  %s613_s10 = scalar_lea.hbm %s1493_s3, %s730_s8 }
 0x150   : > { %554 = vmatpush.bf16.xpose.msra.mxu0 %v548_v24  ;;  %v1344_v2 = vpop.eup %835  ;;  %v372_v46 = vmul.f32 %v1333_v7, %v1277_v12  ;;  %v510_v47 = vmul.f32 %v440_v16, %v1091_v32  ;;  %v384_v48 = vmul.f32 0.5, %v383_v44  ;;  %v406_v10 = vmul.f32 %v1242_v35, %v405_v41  ;;  %vm1367_vm4 = vmor %vm417_vm15, %vm418_vm2  ;;  %s617_s11 = sshll.u32 %s613_s10, 4  ;;  %s618_s11 = int_to_ptr.hbm [resolvable:$true] %s617_s11 }
 0x151   : > { %839 = vrsqrt.f32 %v1335_v14  ;;  %v362_v53 = vmul.f32 %v1344_v2, %v1292_v1  ;;  %v416_v55 = vmul.f32 %v1249_v39, %v415_v27  ;;  %v395_v33 = vsub.f32 1.5, %v394_v45  ;;  %s857_s24 = sshra.s32 %s618_s11, 4  ;;  %s858_s24 = int_to_ptr.hbm [resolvable:$true] %s857_s24 }
 0x152   : > { %v373_v32 = vmul.f32 %v1333_v7, %v372_v46  ;;  %v521_v59 = vpack.c.bf16 %v510_v47, %v509_v61  ;;  %v385_v21 = vsub.f32 1.5, %v384_v48  ;;  %v410_v3 = vsel %vm1357_vm3, %v1242_v35, %v406_v10  ;;  %v525_v61 = vld [vmem:[#allocation2] sm:$0xf]  ;;  %s859_s27 = scalar_lea.hbm %s858_s24, 8  ;;  %p864_p5 = scmp.lt.s32.totalorder %s858_s24, %s1493_s3 }
 0x153   : > { %v363_v63 = vmul.f32 %v1344_v2, %v362_v53  ;;  %v420_v54 = vsel %vm1367_vm4, %v1249_v39, %v416_v55  ;;  %vm397_vm6 = vweird.f32 %v1226_v18  ;;  %vm398_vm7 = vweird.f32 %v1281_v62  ;;  %p860_p1 = scmp.ne.s32.totalorder %s858_s24, %s859_s27  ;;  %p865_p6 = scmp.lt.s32.totalorder %s863_s4, %s859_s27 }
 0x154   : > { %vm387_vm8 = vweird.f32 %v1238_v29  ;;  %vm388_vm9 = vweird.f32 %v1298_v9  ;;  %v374_v0 = vmul.f32 0.5, %v373_v32  ;;  %v542_v35 = vsel %vm276_vm5, %v521_v59, 0  ;;  %vm1392_vm10 = vmor %vm397_vm6, %vm398_vm7 }
 0x155   : > { %v1372_v60 = vpop.eup %837  ;;  %v507_v8 = vmul.f32 %v410_v3, %v1097_v34  ;;  %v508_v39 = vmul.f32 %v420_v54, %v1108_v40  ;;  %v364_v18 = vmul.f32 0.5, %v363_v63  ;;  %v386_v13 = vmul.f32 %v1298_v9, %v385_v21  ;;  %vm389_vm11 = vmor %vm387_vm8, %vm388_vm9  ;;  %p861_p2 = pnand %p860_p1, %p1011_p3  ;;  %p866_p7 = por %p865_p6, %p864_p5 }
 0x156   : > { %v342_v15 = vmul.f32 %v1372_v60, %v1331_v38  ;;  %v396_v30 = vmul.f32 %v1281_v62, %v395_v33  ;;  %v375_v24 = vsub.f32 1.5, %v374_v0  ;;  %vm377_vm12 = vweird.f32 %v1277_v12 }
 0x157   : > { %v1381_v4 = vpop.eup %839  ;;  %v520_v17 = vpack.c.bf16 %v508_v39, %v507_v8  ;;  %v365_v40 = vsub.f32 1.5, %v364_v18  ;;  %v390_v5 = vsel %vm389_vm11, %v1298_v9, %v386_v13  ;;  %vm378_vm13 = vweird.f32 %v1333_v7  ;;  %p862_p4 = pneg %p861_p2 }
 0x158   : > { %555 = vmatpush.bf16.xpose.msra.mxu0 %v545_v56  ;;  %v352_v29 = vmul.f32 %v1381_v4, %v1335_v14  ;;  %v343_v34 = vmul.f32 %v1372_v60, %v342_v15  ;;  %v400_v23 = vsel %vm1392_vm10, %v1281_v62, %v396_v30  ;;  %vm367_vm14 = vweird.f32 %v1292_v1  ;;  %vm1414_vm0 = vmor %vm377_vm12, %vm378_vm13 }
 0x159   : > { %vm368_vm15 = vweird.f32 %v1344_v2  ;;  %v539_v28 = vsel %vm276_vm5, %v520_v17, 0  ;;  %v505_v6 = vmul.f32 %v390_v5, %v1112_v42  ;;  %v506_v37 = vmul.f32 %v400_v23, %v1115_v43  ;;  %p867_p9 = pnand %p866_p7, %p862_p4 }
 0x15a   : > { %v353_v19 = vmul.f32 %v1381_v4, %v352_v29  ;;  %v344_v25 = vmul.f32 0.5, %v343_v34  ;;  %v366_v12 = vmul.f32 %v1344_v2, %v365_v40  ;;  %v376_v1 = vmul.f32 %v1333_v7, %v375_v24  ;;  %vm369_vm1 = vmor %vm367_vm14, %vm368_vm15 }
 0x15b   : > { %v939_v36 = vmov 0   ;;  %v519_v42 = vpack.c.bf16 %v506_v37, %v505_v6  ;;  %vm347_vm2 = vweird.f32 %v1331_v38  ;;  %vm348_vm3 = vweird.f32 %v1372_v60 }
 0x15c   : > { %v354_v62 = vmul.f32 0.5, %v353_v19  ;;  %807 = vset.pattern.permute.xlu1 %v939_v36  ;;  %808 = vset.pattern.permute.xlu0 %v939_v36  ;;  %v345_v43 = vsub.f32 1.5, %v344_v25  ;;  %v370_v41 = vsel %vm369_vm1, %v1344_v2, %v366_v12  ;;  %v380_v20 = vsel %vm1414_vm0, %v1333_v7, %v376_v1  ;;  %vm349_vm7 = vmor %vm347_vm2, %vm348_vm3 }
 0x15d   : > { %594 = vperm.xlu1 %807, %v587_v31   ;;  %vm357_vm4 = vweird.f32 %v1335_v14  ;;  %vm358_vm6 = vweird.f32 %v1381_v4  ;;  %v536_v27 = vsel %vm276_vm5, %v519_v42, 0  ;;  %v503_v44 = vmul.f32 %v370_v41, %v1130_v51 }
 0x15e   : > { %v355_v22 = vsub.f32 1.5, %v354_v62  ;;  %v504_v26 = vmul.f32 %v380_v20, %v1127_v50  ;;  %v346_v2 = vmul.f32 %v1372_v60, %v345_v43  ;;  %vm359_vm8 = vmor %vm357_vm4, %vm358_vm6  ;;  %v588_v57 = vlaneseq }
 0x15f   : > { %v591_v21 = vstv %s727_s6 }
 0x160   : > { %556 = vmatpush.bf16.xpose.msra.mxu0 %v542_v35  ;;  %v356_v16 = vmul.f32 %v1381_v4, %v355_v22  ;;  %v518_v38 = vpack.c.bf16 %v504_v26, %v503_v44  ;;  %v350_v7 = vsel %vm349_vm7, %v1372_v60, %v346_v2  ;;  %v589_v59 = vand.u32 127, %v588_v57 }
 0x161   : > { %v501_v46 = vmul.f32 %v350_v7, %v1133_v52 }
 0x162   : > { %v360_v14 = vsel %vm359_vm8, %v1381_v4, %v356_v16  ;;  %v533_v45 = vsel %vm276_vm5, %v518_v38, 0  ;;  %v592_v54 = vadd.s32 %v591_v21, %v589_v59 }
 0x163   : > { %v502_v51 = vmul.f32 %v360_v14, %v1144_v58 }
 0x165   : > { %v517_v50 = vpack.c.bf16 %v502_v51, %v501_v46 }
 0x167   : > { %v530_v56 = vsel %vm276_vm5, %v517_v50, 0 }
 0x168   : > { %557 = vmatpush.bf16.xpose.msra.mxu0 %v539_v28 }
 0x170   : > { %558 = vmatpush.bf16.xpose.msra.mxu0 %v536_v27 }
 0x178   : > { %559 = vmatpush.bf16.xpose.msra.mxu0 %v533_v45 }
 0x180   : > { %560 = vmatpush.bf16.xpose.msra.mxu0 %v530_v56 }
 0x187   : > { %725 = vmatmul.msk.bf16.vlgmr.msra.gmra.mxu0 %vm276_vm5, %v525_v61 }
 0x1cf   : > { %v595_v0 = vpop.permute.xlu1 %594 }
 0x1d0   : > { %vm596_vm10 = vcmp.eq.s32.totalorder %v592_v54, %v595_v0 }
 0x204   : > { %v562_v47 = vpop.f32.mrf.mxu0 }
 0x205   : > { %v566_v49 = vmul.f32 %v562_v47, %v562_v47  ;;  %v581_v35 = vmul.f32 0.87758255, %v562_v47  ;;  %v726_v39 = vadd.f32 -0.23971277, %v562_v47  ;;  %vm584_vm11 = vcmp.gt.f32.partialorder %v562_v47, -0.87758255 }
 0x207   : > { %v567_v48 = vsub.f32 1.0, %v566_v49 }
 0x209   : > { %v568_v53 = vmax.f32 %v567_v48, 0.0 }
 0x20b   : > { %841 = vrsqrt.f32 %v568_v53  ;;  %vm576_vm5 = vcmp.eq.f32.partialorder %v568_v53, inf  ;;  %v579_v3 = vand.u32 2147483648, %v568_v53  ;;  %vm578_vm9 = vcmp.eq.f32.partialorder %v568_v53, 0.0 }
 0x20c   : > { %v564_v10 = vpop.f32.mrf.mxu0 }
 0x211   : > { %v842_v52 = vpop.eup %841 }
 0x212   : > { %v570_v55 = vmul.f32 %v842_v52, %v568_v53 }
 0x214   : > { %v571_v58 = vmul.f32 %v842_v52, %v570_v55 }
 0x216   : > { %v572_v32 = vmul.f32 0.5, %v571_v58 }
 0x218   : > { %v573_v33 = vsub.f32 1.5, %v572_v32 }
 0x21a   : > { %v574_v60 = vmul.f32 %v842_v52, %v573_v33 }
 0x21c   : > { %v575_v63 = vmul.f32 %v574_v60, %v568_v53 }
 0x21e   : > { %v577_v4 = vsel %vm576_vm5, %v568_v53, %v575_v63 }
 0x21f   : > { %v580_v15 = vsel %vm578_vm9, %v579_v3, %v577_v4 }
 0x220   : > { %v582_v8 = vmul.f32 0.47942555, %v580_v15 }
 0x222   : > { %v583_v11 = vsub.f32 %v581_v35, %v582_v8 }
 0x224   : > { %v586_v18 = vsel %vm584_vm11, %v583_v11, %v726_v39 }
 0x225   : > { %v597_v29 = vsel %vm596_vm10, %v586_v18, %v562_v47 }
 0x226   : > { %v598_v13 = vmul.f32 30.0, %v597_v29 }
 0x228   : > { %599 = vst [vmem:[%s204_s23] sm:$0xff] %v598_v13 }
 0x229   : > { %870 = shalt.err (!%p867_p9)
}
 0x22a   : > { %733 = dma.vmem_to_hbm [thread:$0]  (%p1011_p3), %s616_s15, 128, %s618_s11, %s601_s21  }
 0x22b PF: > { %p739_p10 = scmp.ge.s32.totalorder %s937_s19, 2  ;;  %s629_s23 = sand.u32 1, %s909_s12  }
 0x22c   : > { %s630_s5 = scalar_lea.sflag [#allocation4], %s629_s23 }
 0x22d   : > { %p736_p11 = pnand %p739_p10, %p1020_p8 }
 0x22f   : > { %p737_p12 = pneg %p736_p11 }
 0x231   : > { %904 = dma.done.wait (%p737_p12), %s630_s5, 128  }
 0x232   : > { %906 = vsyncadd (%p737_p12), %s630_s5, 4294967168  ;;  %s16_s19 = sadd.s32 1, %s937_s19   ;;  %s1522_s25 = sld [smem:[#allocation6_spill]] }
 0x233   : > { %p13_p13 = scmp.ge.s32.totalorder %s16_s19, 6   ;;  %s1523_s12 = smov %s913_s13 }
 0x234   : > { %s1524_s13 = smov %s917_s14  ;;  %s1525_s14 = smov %s1029_s30 }
 0x235   : > { %s1526_s15 = smov %s929_s17  ;;  %s1527_s16 = smov %s933_s18 }
 0x236   : > { %s1528_s17 = smov %s1531_s22  ;;  %15 = sbr.rel (!%p13_p13) target bundleno = 5 (0x5), region = 77 }
 0x238   : > { %s1529_s18 = smov %s1522_s25 }
 0x23b   :  { %636 = vsyncpa [#allocation4], 1 }
 0x23c   :  { %638 = vsyncpa [#allocation4 + $0x1], 1 }

</bundles_post_ra>
